<compile_context>
chip_gen: v5e
topology: v5e:2x2
jax: 0.10.0
libtpu: 0.0.40
codegen_flags: <defaults>
</compile_context>

<pallas_src>
import functools

import jax
import jax.numpy as jnp
from jax import lax
from jax.experimental import pallas as pl
from jax.experimental.pallas import tpu as pltpu


def _round_up(a, m):
    return (a + m - 1) // m * m


# ----------------------------------------------------------------------------
# Kernels
# ----------------------------------------------------------------------------
def fused_pgd_kernel(x_ref, pinit_ref, mask_ref, y1h_ref, w_ref, b_ref,
                     patch_out_ref, logits_out_ref, *, num_steps, step_size):
    """One (mask restart, batch tile): full PGD loop + final forward, fused."""
    m = mask_ref[...]                                    # (1, D)  f32 0/1
    x_bg = x_ref[...].astype(jnp.float32) * (1.0 - m)    # (TB, D) hoisted once
    w = w_ref[...]                                       # (D, Kp) bf16
    b = b_ref[...]                                       # (1, Kp) f32 (-1e30 pad)
    y1h = y1h_ref[...]                                   # (TB, Kp) f32

    def forward(patch):
        # where(mask, patch, x) == x*(1-m) + m*patch for a 0/1 mask
        xin = (x_bg + m * patch).astype(jnp.bfloat16)
        return jnp.dot(xin, w, preferred_element_type=jnp.float32) + b

    def body(_, patch):
        logits = forward(patch)                          # (TB, Kp)
        lmax = jnp.max(logits, axis=-1, keepdims=True)
        e = jnp.exp(logits - lmax)                       # padded cols -> 0
        p = e * pl.reciprocal(jnp.sum(e, axis=-1, keepdims=True), approx=True)
        delta = (p - y1h).astype(jnp.bfloat16)           # (TB, Kp)
        # grad wrt network input: delta @ W^T, contracting the class axis
        g_in = lax.dot_general(
            delta, w, dimension_numbers=(((1,), (1,)), ((), ())),
            preferred_element_type=jnp.float32)          # (TB, D)
        g_patch = m * g_in
        return jnp.clip(patch + step_size * jnp.sign(g_patch), 0.0, 1.0)

    patch = lax.fori_loop(0, num_steps, body, pinit_ref[...], unroll=True)
    patch_out_ref[...] = patch
    logits_out_ref[...] = forward(patch)


def clean_logits_kernel(x_ref, w_ref, b_ref, o_ref):
    o_ref[...] = (jnp.dot(x_ref[...], w_ref[...],
                          preferred_element_type=jnp.float32) + b_ref[...])


def select_kernel(x_ref, patch_ref, mask_ref, o_ref):
    o_ref[...] = jnp.where(mask_ref[...] != 0.0, patch_ref[...], x_ref[...])


# ----------------------------------------------------------------------------
# Pallas wrappers
# ----------------------------------------------------------------------------
def run_patch_pgd_grid(x_bf16, patch_init_all, mask_stack, y1h, w_bf16, b_pad,
                       *, num_steps, step_size, tb):
    n_masks = mask_stack.shape[0]
    B_pad, D = x_bf16.shape
    Kp = w_bf16.shape[1]
    kern = functools.partial(fused_pgd_kernel, num_steps=int(num_steps),
                             step_size=float(step_size))
    return pl.pallas_call(
        kern,
        out_shape=(jax.ShapeDtypeStruct((n_masks, B_pad, D), jnp.float32),
                   jax.ShapeDtypeStruct((n_masks, B_pad, Kp), jnp.float32)),
        grid_spec=pltpu.PrefetchScalarGridSpec(
            num_scalar_prefetch=0,
            grid=(B_pad // tb, n_masks),            # batch outer -> x stays resident
            in_specs=[
                pl.BlockSpec((tb, D), lambda bi, mi: (bi, 0)),        # x (bf16)
                pl.BlockSpec((None, tb, D), lambda bi, mi: (mi, bi, 0)),  # patch init
                pl.BlockSpec((None, 1, D), lambda bi, mi: (mi, 0, 0)),    # mask
                pl.BlockSpec((tb, Kp), lambda bi, mi: (bi, 0)),       # one-hot labels
                pl.BlockSpec((D, Kp), lambda bi, mi: (0, 0)),         # W (bf16, resident)
                pl.BlockSpec((1, Kp), lambda bi, mi: (0, 0)),         # bias
            ],
            out_specs=(
                pl.BlockSpec((None, tb, D), lambda bi, mi: (mi, bi, 0)),
                pl.BlockSpec((None, tb, Kp), lambda bi, mi: (mi, bi, 0)),
            ),
        ),
        compiler_params=pltpu.CompilerParams(
            dimension_semantics=("parallel", "parallel")),
    )(x_bf16, patch_init_all, mask_stack, y1h, w_bf16, b_pad)


def clean_logits(x_bf16, w_bf16, b_pad, *, tb):
    B_pad, D = x_bf16.shape
    Kp = w_bf16.shape[1]
    return pl.pallas_call(
        clean_logits_kernel,
        out_shape=jax.ShapeDtypeStruct((B_pad, Kp), jnp.float32),
        grid_spec=pltpu.PrefetchScalarGridSpec(
            num_scalar_prefetch=0,
            grid=(B_pad // tb,),
            in_specs=[
                pl.BlockSpec((tb, D), lambda bi: (bi, 0)),
                pl.BlockSpec((D, Kp), lambda bi: (0, 0)),
                pl.BlockSpec((1, Kp), lambda bi: (0, 0)),
            ],
            out_specs=pl.BlockSpec((tb, Kp), lambda bi: (bi, 0)),
        ),
        compiler_params=pltpu.CompilerParams(dimension_semantics=("parallel",)),
    )(x_bf16, w_bf16, b_pad)


def select_mix(x, patch, mask, *, tb):
    B_pad, D = x.shape
    return pl.pallas_call(
        select_kernel,
        out_shape=jax.ShapeDtypeStruct((B_pad, D), jnp.float32),
        grid_spec=pltpu.PrefetchScalarGridSpec(
            num_scalar_prefetch=0,
            grid=(B_pad // tb,),
            in_specs=[pl.BlockSpec((tb, D), lambda bi: (bi, 0))] * 3,
            out_specs=pl.BlockSpec((tb, D), lambda bi: (bi, 0)),
        ),
        compiler_params=pltpu.CompilerParams(dimension_semantics=("parallel",)),
    )(x, patch, mask)


# ----------------------------------------------------------------------------
# Glue: grid mask generation + attack driver (mirrors PatchPGDGrid.forward)
# ----------------------------------------------------------------------------
def get_grid_masks(img_size, patch_size, patch_stride):
    masks = []
    for h in range(0, img_size + 1 - patch_size, patch_stride):
        for w in range(0, img_size + 1 - patch_size, patch_stride):
            m = jnp.zeros((img_size, img_size), dtype=jnp.float32)
            m = m.at[h:h + patch_size, w:w + patch_size].set(1.0)
            masks.append(m)
    return masks


def patch_pgd_grid_forward(x_nchw, y, w, b, *, patch_size, patch_stride,
                           num_steps, step_size, key):
    B, C, H, W = x_nchw.shape
    D = C * H * W
    K = w.shape[1]

    Kp = _round_up(K, 128)                 # full MXU lane width for logits
    B_pad = _round_up(B, 8)
    TB = min(128, B_pad)                   # batch tile (sublane-aligned)
    B_pad = _round_up(B_pad, TB)

    # flatten + pad batch
    x = x_nchw.reshape(B, D).astype(jnp.float32)
    x_pad = jnp.pad(x, ((0, B_pad - B), (0, 0)))
    x_bf16 = x_pad.astype(jnp.bfloat16)
    y_pad = jnp.pad(y, (0, B_pad - B))
    y1h = jax.nn.one_hot(y_pad, Kp, dtype=jnp.float32)

    # pad classifier: zero weight columns, -1e30 padded bias so padded logits
    # never win softmax/argmax
    w_pad = jnp.pad(w.astype(jnp.float32), ((0, 0), (0, Kp - K))).astype(jnp.bfloat16)
    b_pad = jnp.concatenate(
        [b.astype(jnp.float32).reshape(1, K),
         jnp.full((1, Kp - K), -1e30, jnp.float32)], axis=1)

    # stacked per-restart masks, broadcast over channels, flattened
    masks = get_grid_masks(H, patch_size, patch_stride)
    n_masks = len(masks)
    mask_stack = jnp.stack(
        [jnp.broadcast_to(m[None], (C, H, W)).reshape(D) for m in masks]
    ).reshape(n_masks, 1, D)

    # RNG: default patch (torch.rand_like(x)) + one random init per mask restart
    key, k0, k1 = jax.random.split(key, 3)
    patch_default = jax.random.uniform(k0, (B_pad, D), dtype=jnp.float32)
    patch_init_all = jax.random.uniform(k1, (n_masks, B_pad, D), dtype=jnp.float32)

    # clean classification of the unperturbed images
    logits0 = clean_logits(x_bf16, w_pad, b_pad, tb=TB)
    correct = jnp.argmax(logits0, axis=-1) == y_pad

    # fused PGD: every mask restart (num_steps steps + final forward) in one call
    patch_all, logits_all = run_patch_pgd_grid(
        x_bf16, patch_init_all, mask_stack, y1h, w_pad, b_pad,
        num_steps=num_steps, step_size=step_size, tb=TB)
    fooled_all = jnp.argmax(logits_all, axis=-1) != y_pad[None, :]

    # first-fooling-mask-wins bookkeeping (== sequential PyTorch loop; the
    # data-dependent early break is a no-op and omitted)
    patch_out = patch_default
    mask_out = jnp.zeros((B_pad, D), jnp.float32)
    for mi in range(n_masks):
        update = jnp.logical_and(correct, fooled_all[mi])
        correct = jnp.logical_and(correct, jnp.logical_not(fooled_all[mi]))
        patch_out = jnp.where(update[:, None], patch_all[mi], patch_out)
        mask_out = jnp.where(update[:, None], mask_stack[mi], mask_out)

    out_pad = select_mix(x_pad, patch_out, mask_out, tb=TB)  # where(mask, patch, x)
    return out_pad[:B].reshape(B, C, H, W)


# ----------------------------------------------------------------------------
if __name__ == "__main__":
    B, C, H, W = 2, 4, 16, 16
    K = 8                      # classes of the synthetic linear classifier
    patch_size, patch_stride = 8, 8
    num_steps, step_size = 3, 0.05
    D = C * H * W

    key = jax.random.PRNGKey(0)
    kx, ky, kw, kb, kp = jax.random.split(key, 5)

    x = jax.random.uniform(kx, (B, C, H, W), dtype=jnp.float32)
    y = jax.random.randint(ky, (B,), 0, K)
    # deterministic synthetic linear "model" parameters
    w_param = jax.random.normal(kw, (D, K), dtype=jnp.float32) * 0.02
    b_param = jax.random.normal(kb, (1, K), dtype=jnp.float32) * 0.01

    out = patch_pgd_grid_forward(
        x, y, w_param, b_param,
        patch_size=patch_size, patch_stride=patch_stride,
        num_steps=num_steps, step_size=step_size, key=kp)
    jax.block_until_ready(out)

    assert out.shape == (B, C, H, W) and out.dtype == jnp.float32
    print("KERNEL_OK")
</pallas_src>

<mosaic_0001>
module attributes {stable_mosaic.version = 11 : i64} {
  func.func @clean_logits_kernel(%arg0: i32, %arg1: memref<8x1024xbf16, #tpu.memory_space<vmem>>, %arg2: memref<1024x128xbf16, #tpu.memory_space<vmem>>, %arg3: memref<1x128xf32, #tpu.memory_space<vmem>>, %arg4: memref<8x128xf32, #tpu.memory_space<vmem>>) attributes {dimension_semantics = [#tpu.dimension_semantics<parallel>], iteration_bounds = array<i64: 1>, scalar_prefetch = 0 : i64, scratch_operands = 0 : i64, tpu.core_type = #tpu.core_type<tc>, window_params = [{transform_indices = @transform_0, window_bounds = array<i64: 8, 1024>}, {pipeline_mode = #tpu.pipeline_mode<synchronous>, transform_indices = @transform_1, window_bounds = array<i64: 1024, 128>}, {pipeline_mode = #tpu.pipeline_mode<synchronous>, transform_indices = @transform_2, window_bounds = array<i64: 1, 128>}, {transform_indices = @transform_3, window_bounds = array<i64: 8, 128>}]} {
    %c0 = arith.constant 0 : index
    %c0_0 = arith.constant 0 : index
    %0 = vector.load %arg1[%c0, %c0_0] : memref<8x1024xbf16, #tpu.memory_space<vmem>>, vector<8x1024xbf16>
    %c0_1 = arith.constant 0 : index
    %c0_2 = arith.constant 0 : index
    %1 = vector.load %arg2[%c0_1, %c0_2] : memref<1024x128xbf16, #tpu.memory_space<vmem>>, vector<1024x128xbf16>
    %cst = arith.constant dense<0.000000e+00> : vector<8x128xf32>
    %2 = tpu.matmul %0, %1, %cst {dimension_numbers = #tpu.dot_dimension_numbers<[1], [0], [0], [1], [0, 0, 1, 1], [], []>} : vector<8x1024xbf16>, vector<1024x128xbf16>, vector<8x128xf32> -> vector<8x128xf32>
    %c0_3 = arith.constant 0 : index
    %c0_4 = arith.constant 0 : index
    %3 = vector.load %arg3[%c0_3, %c0_4] : memref<1x128xf32, #tpu.memory_space<vmem>>, vector<1x128xf32>
    %4 = vector.broadcast %3 : vector<1x128xf32> to vector<8x128xf32>
    %5 = arith.addf %2, %4 : vector<8x128xf32>
    %c0_5 = arith.constant 0 : index
    %c0_6 = arith.constant 0 : index
    %6 = vector.load %arg4[%c0_5, %c0_6] : memref<8x128xf32, #tpu.memory_space<vmem>>, vector<8x128xf32>
    tpu.vector_store %arg4[%c0_5, %c0_6], %5 {strides = array<i32>} : memref<8x128xf32, #tpu.memory_space<vmem>>, vector<8x128xf32>,
    return
  }
  func.func @transform_0(%arg0: i32) -> (i32, i32) {
    %c0_i32 = arith.constant 0 : i32
    %c0_i32_0 = arith.constant 0 : i32
    return %arg0, %c0_i32 : i32, i32
  }
  func.func @transform_1(%arg0: i32) -> (i32, i32) {
    %c0_i32 = arith.constant 0 : i32
    %c0_i32_0 = arith.constant 0 : i32
    %c0_i32_1 = arith.constant 0 : i32
    return %c0_i32, %c0_i32_0 : i32, i32
  }
  func.func @transform_2(%arg0: i32) -> (i32, i32) {
    %c0_i32 = arith.constant 0 : i32
    %c0_i32_0 = arith.constant 0 : i32
    %c0_i32_1 = arith.constant 0 : i32
    return %c0_i32, %c0_i32_0 : i32, i32
  }
  func.func @transform_3(%arg0: i32) -> (i32, i32) {
    %c0_i32 = arith.constant 0 : i32
    %c0_i32_0 = arith.constant 0 : i32
    return %arg0, %c0_i32 : i32, i32
  }
}

</mosaic_0001>

<bundles_post_ra>
// kernel: tpu_custom_call.1
= control target key start
LH: loop header
LB: loop body
LE: loop exit
PB: predicated region body
PF: predicated region fallthrough
CT: control target
= control target key end

     0   :  { %8 = vsyncpa [#allocation3], 0  ;;  %s1157_s0 = inlined_call_operand.hbm [shape: bf16[8,1024], index: 0, kind: input, shape index: {}]   ;;  %s1158_s1 = inlined_call_operand.hbm [shape: bf16[1024,128], index: 1, kind: input, shape index: {}]   ;;  %s1159_s2 = inlined_call_operand.vmem [shape: f32[1,128], index: 2, kind: input, shape index: {}]   ;;  %s1160_s3 = inlined_call_operand.hbm [shape: f32[8,128], index: 3, kind: output, shape index: {}]  }
   0x1   :  { %9 = vsyncpa [#allocation6], 0 }
   0x2   :  { %10 = vsyncpa [#allocation4], 0  ;;  %s16_s14 = sshll.u32 %s1157_s0, 4  ;;  %s1120_s15 = smov [#allocation2]   ;;  %s17_s14 = int_to_ptr.hbm [resolvable:$true] %s16_s14 }
   0x3   :  { %s18_s16 = sshll.u32 %s1120_s15, 4  ;;  %s26_s19 = sshll.u32 %s1158_s1, 4  ;;  %s19_s16 = int_to_ptr.vmem [resolvable:$true] %s18_s16  ;;  %s27_s19 = int_to_ptr.hbm [resolvable:$true] %s26_s19 }
   0x4   :  { %21 = dma.hbm_to_vmem [thread:$0]  %s17_s14, 512, %s19_s16, [#allocation3]  }
   0x5   :  { %s1121_s20 = smov [#allocation5]   ;;  %s1122_s22 = smov 64  }
   0x6   :  { %s28_s21 = sshll.u32 %s1121_s20, 4  ;;  %s1123_s23 = smov 4   ;;  %s29_s21 = int_to_ptr.vmem [resolvable:$true] %s28_s21 }
   0x7   :  { %34 = dma.hbm_to_vmem [thread:$0]  %s27_s19, 8192, %s29_s21, [#allocation6], %s1122_s22, %s1122_s22, %s1123_s23  }
   0x8   :  { %1114 = dma.done.wait [#allocation3], 512  }
   0x9   :  { %1115 = vsyncadd [#allocation3], 4294966784 }
   0xa   :  { %1116 = dma.done.wait [#allocation6], 8192  }
   0xb   :  { %1117 = vsyncadd [#allocation6], 4294959104  ;;  %v979_v0 = vld [vmem:[#allocation5 + $0x38] sm:$0xff]  ;;  %v978_v4 = vld [vmem:[#allocation5 + $0x30] sm:$0xff]  ;;  %s1124_s24 = smov [#allocation7]   ;;  %s705_s28 = sshll.u32 %s1160_s3, 4  ;;  %s706_s28 = int_to_ptr.hbm [resolvable:$true] %s705_s28 }
   0xc   :  { %v987_v1 = vld [vmem:[#allocation5 + $0x78] sm:$0xff]  ;;  %593 = vmatpush.bf16.msra.mxu0 %v979_v0  ;;  %v986_v5 = vld [vmem:[#allocation5 + $0x70] sm:$0xff]  ;;  %v977_v8 = vld [vmem:[#allocation5 + $0x28] sm:$0xff]  ;;  %s703_s25 = sshll.u32 %s1124_s24, 4  ;;  %s704_s25 = int_to_ptr.vmem [resolvable:$true] %s703_s25 }
   0xd   :  { %v995_v2 = vld [vmem:[#allocation5 + $0xb8] sm:$0xff]  ;;  %606 = vmatpush.bf16.msra.mxu1 %v987_v1  ;;  %v994_v6 = vld [vmem:[#allocation5 + $0xb0] sm:$0xff]  ;;  %v985_v9 = vld [vmem:[#allocation5 + $0x68] sm:$0xff] }
   0xe   :  { %v1003_v3 = vld [vmem:[#allocation5 + $0xf8] sm:$0xff]  ;;  %619 = vmatpush.bf16.msra.mxu2 %v995_v2  ;;  %v1002_v7 = vld [vmem:[#allocation5 + $0xf0] sm:$0xff]  ;;  %v993_v10 = vld [vmem:[#allocation5 + $0xa8] sm:$0xff] }
   0xf   :  { %632 = vmatpush.bf16.msra.mxu3 %v1003_v3  ;;  %v1001_v11 = vld [vmem:[#allocation5 + $0xe8] sm:$0xff]  ;;  %v976_v12 = vld [vmem:[#allocation5 + $0x20] sm:$0xff]  ;;  %v975_v16 = vld [vmem:[#allocation5 + $0x18] sm:$0xff] }
  0x10   :  { %594 = vmatpush.bf16.msra.mxu0 %v978_v4  ;;  %v984_v13 = vld [vmem:[#allocation5 + $0x60] sm:$0xff]  ;;  %v983_v17 = vld [vmem:[#allocation5 + $0x58] sm:$0xff]  ;;  %v974_v20 = vld [vmem:[#allocation5 + $0x10] sm:$0xff] }
  0x11   :  { %607 = vmatpush.bf16.msra.mxu1 %v986_v5  ;;  %v992_v14 = vld [vmem:[#allocation5 + $0xa0] sm:$0xff]  ;;  %v991_v18 = vld [vmem:[#allocation5 + $0x98] sm:$0xff]  ;;  %v982_v21 = vld [vmem:[#allocation5 + $0x50] sm:$0xff] }
  0x12   :  { %620 = vmatpush.bf16.msra.mxu2 %v994_v6  ;;  %v1000_v15 = vld [vmem:[#allocation5 + $0xe0] sm:$0xff]  ;;  %v999_v19 = vld [vmem:[#allocation5 + $0xd8] sm:$0xff]  ;;  %v990_v22 = vld [vmem:[#allocation5 + $0x90] sm:$0xff] }
  0x13   :  { %633 = vmatpush.bf16.msra.mxu3 %v1002_v7  ;;  %v998_v23 = vld [vmem:[#allocation5 + $0xd0] sm:$0xff]  ;;  %v973_v24 = vld [vmem:[#allocation5 + $0x8] sm:$0xff]  ;;  %v45_v29 = vld [vmem:[#allocation2] sm:$0xff] }
  0x14   :  { %595 = vmatpush.bf16.msra.mxu0 %v977_v8  ;;  %v981_v25 = vld [vmem:[#allocation5 + $0x48] sm:$0xff]  ;;  %v972_v30 = vld [vmem:[#allocation5] sm:$0xff]  ;;  %v185_v36 = vunpack.c.l.b16 %v45_v29  ;;  %v186_v37 = vunpack.c.h.b16 %v45_v29  ;;  %v1011_v38 = vld [vmem:[#allocation5 + $0x138] sm:$0xff] }
  0x15   :  { %608 = vmatpush.bf16.msra.mxu1 %v985_v9  ;;  %v989_v26 = vld [vmem:[#allocation5 + $0x88] sm:$0xff]  ;;  %v980_v31 = vld [vmem:[#allocation5 + $0x40] sm:$0xff]  ;;  %v1019_v39 = vld [vmem:[#allocation5 + $0x178] sm:$0xff] }
  0x16   :  { %621 = vmatpush.bf16.msra.mxu2 %v993_v10  ;;  %v997_v27 = vld [vmem:[#allocation5 + $0xc8] sm:$0xff]  ;;  %v988_v34 = vld [vmem:[#allocation5 + $0x80] sm:$0xff]  ;;  %v1027_v40 = vld [vmem:[#allocation5 + $0x1b8] sm:$0xff]  ;;  %v193_v44 = vpack.c.b16 %v185_v36, %v185_v36  ;;  %v194_v45 = vpack.c.b16 %v186_v37, %v186_v37 }
  0x17   :  { %634 = vmatpush.bf16.msra.mxu3 %v1001_v11  ;;  %v46_v28 = vld [vmem:[#allocation2 + $0x8] sm:$0xff]  ;;  %v996_v35 = vld [vmem:[#allocation5 + $0xc0] sm:$0xff]  ;;  %v1035_v41 = vld [vmem:[#allocation5 + $0x1f8] sm:$0xff] }
  0x18   :  { %596 = vmatpush.bf16.msra.mxu0 %v976_v12  ;;  %v187_v32 = vunpack.c.l.b16 %v46_v28  ;;  %v188_v33 = vunpack.c.h.b16 %v46_v28  ;;  %v1010_v46 = vld [vmem:[#allocation5 + $0x130] sm:$0xff]  ;;  %v1009_v50 = vld [vmem:[#allocation5 + $0x128] sm:$0xff]  ;;  %v1008_v54 = vld [vmem:[#allocation5 + $0x120] sm:$0xff] }
  0x19   :  { %609 = vmatpush.bf16.msra.mxu1 %v984_v13  ;;  %v1018_v47 = vld [vmem:[#allocation5 + $0x170] sm:$0xff]  ;;  %v1017_v51 = vld [vmem:[#allocation5 + $0x168] sm:$0xff]  ;;  %v1016_v55 = vld [vmem:[#allocation5 + $0x160] sm:$0xff] }
  0x1a   :  { %622 = vmatpush.bf16.msra.mxu2 %v992_v14  ;;  %v195_v42 = vpack.c.b16 %v187_v32, %v187_v32  ;;  %v196_v43 = vpack.c.b16 %v188_v33, %v188_v33  ;;  %v1026_v48 = vld [vmem:[#allocation5 + $0x1b0] sm:$0xff]  ;;  %v1025_v52 = vld [vmem:[#allocation5 + $0x1a8] sm:$0xff]  ;;  %v1024_v56 = vld [vmem:[#allocation5 + $0x1a0] sm:$0xff] }
  0x1b   :  { %635 = vmatpush.bf16.msra.mxu3 %v1000_v15  ;;  %v1034_v49 = vld [vmem:[#allocation5 + $0x1f0] sm:$0xff]  ;;  %v1033_v53 = vld [vmem:[#allocation5 + $0x1e8] sm:$0xff]  ;;  %v1032_v57 = vld [vmem:[#allocation5 + $0x1e0] sm:$0xff] }
  0x1c   :  { %597 = vmatpush.bf16.msra.mxu0 %v975_v16  ;;  %v1007_v58 = vld [vmem:[#allocation5 + $0x118] sm:$0xff]  ;;  %v1006_v62 = vld [vmem:[#allocation5 + $0x110] sm:$0xff]  ;;  %v1005_v2 = vld [vmem:[#allocation5 + $0x108] sm:$0xff] }
  0x1d   :  { %610 = vmatpush.bf16.msra.mxu1 %v983_v17  ;;  %v1015_v59 = vld [vmem:[#allocation5 + $0x158] sm:$0xff]  ;;  %v1014_v63 = vld [vmem:[#allocation5 + $0x150] sm:$0xff]  ;;  %v1013_v3 = vld [vmem:[#allocation5 + $0x148] sm:$0xff] }
  0x1e   :  { %623 = vmatpush.bf16.msra.mxu2 %v991_v18  ;;  %v1023_v60 = vld [vmem:[#allocation5 + $0x198] sm:$0xff]  ;;  %v1022_v0 = vld [vmem:[#allocation5 + $0x190] sm:$0xff]  ;;  %v1021_v5 = vld [vmem:[#allocation5 + $0x188] sm:$0xff] }
  0x1f   :  { %636 = vmatpush.bf16.msra.mxu3 %v999_v19  ;;  %v1031_v61 = vld [vmem:[#allocation5 + $0x1d8] sm:$0xff]  ;;  %v1030_v1 = vld [vmem:[#allocation5 + $0x1d0] sm:$0xff]  ;;  %v1029_v6 = vld [vmem:[#allocation5 + $0x1c8] sm:$0xff] }
  0x20   :  { %598 = vmatpush.bf16.msra.mxu0 %v974_v20  ;;  %v47_v4 = vld [vmem:[#allocation2 + $0x10] sm:$0xff]  ;;  %v48_v7 = vld [vmem:[#allocation2 + $0x18] sm:$0xff]  ;;  %v1004_v10 = vld [vmem:[#allocation5 + $0x100] sm:$0xff] }
  0x21   :  { %611 = vmatpush.bf16.msra.mxu1 %v982_v21  ;;  %v189_v8 = vunpack.c.l.b16 %v47_v4  ;;  %v190_v9 = vunpack.c.h.b16 %v47_v4  ;;  %v1012_v11 = vld [vmem:[#allocation5 + $0x140] sm:$0xff]  ;;  %v191_v12 = vunpack.c.l.b16 %v48_v7  ;;  %v192_v13 = vunpack.c.h.b16 %v48_v7 }
  0x22   :  { %624 = vmatpush.bf16.msra.mxu2 %v990_v22  ;;  %v1020_v14 = vld [vmem:[#allocation5 + $0x180] sm:$0xff] }
  0x23   :  { %637 = vmatpush.bf16.msra.mxu3 %v998_v23  ;;  %v1028_v15 = vld [vmem:[#allocation5 + $0x1c0] sm:$0xff]  ;;  %v197_v16 = vpack.c.b16 %v189_v8, %v189_v8  ;;  %v198_v17 = vpack.c.b16 %v190_v9, %v190_v9  ;;  %v199_v18 = vpack.c.b16 %v191_v12, %v191_v12  ;;  %v200_v19 = vpack.c.b16 %v192_v13, %v192_v13 }
  0x24   :  { %599 = vmatpush.bf16.msra.mxu0 %v973_v24 }
  0x25   :  { %612 = vmatpush.bf16.msra.mxu1 %v981_v25 }
  0x26   :  { %625 = vmatpush.bf16.msra.mxu2 %v989_v26  ;;  %v1041_v26 = vld [vmem:[%s1159_s2] ss:$0 sm:$0xff] }
  0x27   :  { %638 = vmatpush.bf16.msra.mxu3 %v997_v27 }
  0x28   :  { %600 = vmatpush.bf16.msra.mxu0 %v972_v30 }
  0x29   :  { %613 = vmatpush.bf16.msra.mxu1 %v980_v31 }
  0x2a   :  { %626 = vmatpush.bf16.msra.mxu2 %v988_v34 }
  0x2b   :  { %639 = vmatpush.bf16.msra.mxu3 %v996_v35  ;;  %601 = vmatmul.bf16.vlgmr.msra.gmra.mxu0 %v193_v44 }
  0x2c   :  { %645 = vmatpush.bf16.msrb.mxu0 %v1011_v38  ;;  %614 = vmatmul.bf16.vlgmr.msra.gmra.mxu1 %v194_v45 }
  0x2d   :  { %658 = vmatpush.bf16.msrb.mxu1 %v1019_v39  ;;  %627 = vmatmul.bf16.vlgmr.msra.gmra.mxu2 %v195_v42 }
  0x2e   :  { %671 = vmatpush.bf16.msrb.mxu2 %v1027_v40  ;;  %640 = vmatmul.bf16.vlgmr.msra.gmra.mxu3 %v196_v43 }
  0x2f   :  { %684 = vmatpush.bf16.msrb.mxu3 %v1035_v41 }
  0x30   :  { %646 = vmatpush.bf16.msrb.mxu0 %v1010_v46 }
  0x31   :  { %659 = vmatpush.bf16.msrb.mxu1 %v1018_v47 }
  0x32   :  { %672 = vmatpush.bf16.msrb.mxu2 %v1026_v48 }
  0x33   :  { %685 = vmatpush.bf16.msrb.mxu3 %v1034_v49 }
  0x34   :  { %647 = vmatpush.bf16.msrb.mxu0 %v1009_v50 }
  0x35   :  { %660 = vmatpush.bf16.msrb.mxu1 %v1017_v51 }
  0x36   :  { %673 = vmatpush.bf16.msrb.mxu2 %v1025_v52 }
  0x37   :  { %686 = vmatpush.bf16.msrb.mxu3 %v1033_v53 }
  0x38   :  { %648 = vmatpush.bf16.msrb.mxu0 %v1008_v54 }
  0x39   :  { %661 = vmatpush.bf16.msrb.mxu1 %v1016_v55 }
  0x3a   :  { %674 = vmatpush.bf16.msrb.mxu2 %v1024_v56 }
  0x3b   :  { %687 = vmatpush.bf16.msrb.mxu3 %v1032_v57 }
  0x3c   :  { %649 = vmatpush.bf16.msrb.mxu0 %v1007_v58 }
  0x3d   :  { %662 = vmatpush.bf16.msrb.mxu1 %v1015_v59 }
  0x3e   :  { %675 = vmatpush.bf16.msrb.mxu2 %v1023_v60 }
  0x3f   :  { %688 = vmatpush.bf16.msrb.mxu3 %v1031_v61 }
  0x40   :  { %650 = vmatpush.bf16.msrb.mxu0 %v1006_v62 }
  0x41   :  { %663 = vmatpush.bf16.msrb.mxu1 %v1014_v63 }
  0x42   :  { %676 = vmatpush.bf16.msrb.mxu2 %v1022_v0 }
  0x43   :  { %689 = vmatpush.bf16.msrb.mxu3 %v1030_v1 }
  0x44   :  { %651 = vmatpush.bf16.msrb.mxu0 %v1005_v2 }
  0x45   :  { %664 = vmatpush.bf16.msrb.mxu1 %v1013_v3 }
  0x46   :  { %677 = vmatpush.bf16.msrb.mxu2 %v1021_v5 }
  0x47   :  { %690 = vmatpush.bf16.msrb.mxu3 %v1029_v6 }
  0x48   :  { %652 = vmatpush.bf16.msrb.mxu0 %v1004_v10 }
  0x49   :  { %665 = vmatpush.bf16.msrb.mxu1 %v1012_v11 }
  0x4a   :  { %678 = vmatpush.bf16.msrb.mxu2 %v1020_v14 }
  0x4b   :  { %691 = vmatpush.bf16.msrb.mxu3 %v1028_v15  ;;  %653 = vmatmul.bf16.vlgmr.msrb.gmra.mxu0 %v197_v16 }
  0x4c   :  { %666 = vmatmul.bf16.vlgmr.msrb.gmra.mxu1 %v198_v17 }
  0x4d   :  { %679 = vmatmul.bf16.vlgmr.msrb.gmra.mxu2 %v199_v18 }
  0x4e   :  { %692 = vmatmul.bf16.vlgmr.msrb.gmra.mxu3 %v200_v19 }
  0xa8   :  { %v602_v20 = vpop.f32.mrf.mxu0 }
  0xa9   :  { %v615_v21 = vpop.f32.mrf.mxu1  ;;  %v603_v29 = vadd.f32 %v1041_v26, %v602_v20 }
  0xab   :  { %v616_v30 = vadd.f32 %v615_v21, %v603_v29 }
  0xb0   :  { %v628_v22 = vpop.f32.mrf.mxu2  ;;  %v604_v24 = vpop.f32.mrf.mxu0 }
  0xb1   :  { %v641_v23 = vpop.f32.mrf.mxu3  ;;  %v617_v25 = vpop.f32.mrf.mxu1  ;;  %v629_v31 = vadd.f32 %v628_v22, %v616_v30 }
  0xb3   :  { %v642_v32 = vadd.f32 %v641_v23, %v629_v31 }
  0xb8   :  { %v630_v27 = vpop.f32.mrf.mxu2 }
  0xb9   :  { %v643_v28 = vpop.f32.mrf.mxu3 }
  0xc8   :  { %v654_v33 = vpop.f32.mrf.mxu0 }
  0xc9   :  { %v667_v34 = vpop.f32.mrf.mxu1  ;;  %v655_v35 = vadd.f32 %v654_v33, %v642_v32 }
  0xcb   :  { %v668_v36 = vadd.f32 %v667_v34, %v655_v35 }
  0xd0   :  { %v680_v37 = vpop.f32.mrf.mxu2  ;;  %v656_v40 = vpop.f32.mrf.mxu0 }
  0xd1   :  { %v693_v38 = vpop.f32.mrf.mxu3  ;;  %v681_v39 = vadd.f32 %v680_v37, %v668_v36  ;;  %v669_v41 = vpop.f32.mrf.mxu1 }
  0xd3   :  { %v694_v42 = vadd.f32 %v693_v38, %v681_v39 }
  0xd5   :  { %697 = vst [vmem:[#allocation7] sm:$0xff] %v694_v42 }
  0xd6   :  { %708 = dma.vmem_to_hbm [thread:$0]  %s704_s25, 128, %s706_s28, [#allocation4]  }
  0xd8   :  { %v682_v43 = vpop.f32.mrf.mxu2 }
  0xd9   :  { %v695_v44 = vpop.f32.mrf.mxu3 }
  0xda   :  { %1118 = dma.done.wait [#allocation4], 128  }
  0xdb   :  { %1119 = vsyncadd [#allocation4], 4294967168 }
  0xdc   :  { %713 = vsyncpa [#allocation3], 1 }
  0xdd   :  { %714 = vsyncpa [#allocation6], 1 }
  0xde   :  { %715 = vsyncpa [#allocation4], 1 }

</bundles_post_ra>
